<compile_context>
chip_gen: v7x
topology: tpu7x:2x2x1
jax: 0.10.0
libtpu: 0.0.40
codegen_flags: <defaults>
</compile_context>

<pallas_src>
import jax
import jax.numpy as jnp
from jax.experimental import pallas as pl
from jax.experimental.pallas import tpu as pltpu


# ---------------------------------------------------------------------------
# Kernel 1: per-branch conv-as-matmul.  x:(TM,K) @ w:(K,S) + b:(1,S) -> (TM,S)
# ---------------------------------------------------------------------------
def _conv_mm_kernel(x_ref, w_ref, b_ref, o_ref):
    acc = jnp.dot(x_ref[...], w_ref[...], preferred_element_type=jnp.float32)
    o_ref[...] = (acc + b_ref[...]).astype(o_ref.dtype)


def _conv_matmul(patches, w_dense, bias, tile_m):
    m, k = patches.shape
    s = w_dense.shape[1]
    return pl.pallas_call(
        _conv_mm_kernel,
        out_shape=jax.ShapeDtypeStruct((m, s), patches.dtype),
        grid_spec=pltpu.PrefetchScalarGridSpec(
            num_scalar_prefetch=0,
            grid=(m // tile_m,),
            in_specs=[
                pl.BlockSpec((tile_m, k), lambda i: (i, 0)),   # activations: M-tiled
                pl.BlockSpec((k, s), lambda i: (0, 0)),        # weight: VMEM-resident
                pl.BlockSpec((1, s), lambda i: (0, 0)),        # bias
            ],
            out_specs=pl.BlockSpec((tile_m, s), lambda i: (i, 0)),
        ),
        compiler_params=pltpu.CompilerParams(
            dimension_semantics=("parallel",)),
    )(patches, w_dense, bias)


# ---------------------------------------------------------------------------
# Kernel 2: fused SE + branch-softmax + weighting + reversed-branch concat.
# One grid step per batch element ("parallel" -> both v7x TensorCores).
# ---------------------------------------------------------------------------
def _se_psa_kernel(f1_ref, f2_ref, f3_ref, f4_ref,
                   w1_ref, b1_ref, w2_ref, b2_ref, o_ref):
    # f*_ref: (HW, S) channel-last branch features for one batch element
    # w1: (S, Rp)  b1: (1, Rp)  w2: (Rp, S)  b2: (1, S)  (Rp = padded SE hidden)
    # o_ref: (4, HW, S) -- branch axis already REVERSED, features weighted
    feats = (f1_ref[...].astype(jnp.float32),
             f2_ref[...].astype(jnp.float32),
             f3_ref[...].astype(jnp.float32),
             f4_ref[...].astype(jnp.float32))

    # Global average pool per branch -> (4, S)
    pooled = jnp.concatenate(
        [jnp.mean(f, axis=0, keepdims=True) for f in feats], axis=0)

    # Shared SE MLP: fc1 -> ReLU -> fc2 -> sigmoid   (padded hidden is exact)
    h = jnp.dot(pooled, w1_ref[...], preferred_element_type=jnp.float32) + b1_ref[...]
    h = jnp.maximum(h, 0.0)
    z = jnp.dot(h, w2_ref[...], preferred_element_type=jnp.float32) + b2_ref[...]
    se = 1.0 / (1.0 + jnp.exp(-z))                    # (4, S)

    # Softmax across the 4 branches, per channel.
    mx = jnp.max(se, axis=0, keepdims=True)
    e = jnp.exp(se - mx)
    att = e / jnp.sum(e, axis=0, keepdims=True)       # (4, S)

    # Weight features, store in reversed-branch order (matches the torch concat).
    for j in range(4):
        src = 3 - j
        o_ref[j] = (feats[src] * att[src:src + 1, :]).astype(o_ref.dtype)


# ---------------------------------------------------------------------------
# Glue (plain JAX): layout prep, im2col, grouped-weight block-dense expansion.
# ---------------------------------------------------------------------------
def _pick_tile_m(m, target=256):
    """Largest multiple-of-8 divisor of m that is <= target (whole m if small)."""
    if m <= target:
        return m
    for tm in range(target, 7, -8):
        if m % tm == 0:
            return tm
    return m


def _im2col_nhwc(x_nhwc, k):
    """Stride-1 'same' im2col: (B,H,W,C) -> (B*H*W, k*k*C), position-major."""
    b, h, w, c = x_nhwc.shape
    p = k // 2
    xp = jnp.pad(x_nhwc, ((0, 0), (p, p), (p, p), (0, 0)))
    cols = [xp[:, dy:dy + h, dx:dx + w, :] for dy in range(k) for dx in range(k)]
    return jnp.concatenate(cols, axis=-1).reshape(b * h * w, k * k * c)


def _expand_grouped_weight(w, groups, in_ch):
    """(S, in_ch//g, k, k) grouped conv weight -> block-dense (k*k*in_ch, S)
    matching the position-major / channel-minor im2col layout above."""
    out_ch, cg, k, _ = w.shape
    og = out_ch // groups
    kk = k * k
    wt = jnp.transpose(w.reshape(out_ch, cg, kk), (2, 1, 0))   # (kk, cg, out_ch)
    dense = jnp.zeros((kk, in_ch, out_ch), dtype=w.dtype)
    for g in range(groups):
        dense = dense.at[:, g * cg:(g + 1) * cg, g * og:(g + 1) * og].set(
            wt[:, :, g * og:(g + 1) * og])
    return dense.reshape(kk * in_ch, out_ch)


def psa_forward(x_nchw, params, conv_kernels=(3, 5, 7, 9), conv_groups=(1, 4, 8, 16)):
    """x_nchw: (B, Cin, H, W) -> (B, 4*S, H, W), same semantics as PSAModule.forward."""
    btch, cin, h, w = x_nchw.shape
    hw = h * w
    m = btch * hw
    s = params["b0"].shape[0]
    dtype = x_nchw.dtype

    # One shared NCHW -> NHWC conversion (channel-last is lane-friendly).
    x_nhwc = jnp.transpose(x_nchw, (0, 2, 3, 1))
    tile_m = _pick_tile_m(m)

    # --- 4 conv branches: im2col + block-dense matmul on the MXU -------------
    feats = []
    for i, (k, g) in enumerate(zip(conv_kernels, conv_groups)):
        patches = _im2col_nhwc(x_nhwc, k)                               # (M, k*k*Cin)
        w_dense = _expand_grouped_weight(params[f"w{i}"], g, cin).astype(dtype)
        bias = params[f"b{i}"].reshape(1, s).astype(dtype)
        f = _conv_matmul(patches, w_dense, bias, tile_m)                # (M, S)
        feats.append(f.reshape(btch, hw, s))

    # --- SE weights: pad hidden dim to a multiple of 8 (numerically exact) ---
    r = params["fc1_b"].shape[0]
    r_pad = max(8, ((r + 7) // 8) * 8)
    w1 = jnp.zeros((s, r_pad), dtype).at[:, :r].set(
        params["fc1_w"].reshape(r, s).T.astype(dtype))
    b1 = jnp.zeros((1, r_pad), dtype).at[:, :r].set(
        params["fc1_b"].reshape(1, r).astype(dtype))
    w2 = jnp.zeros((r_pad, s), dtype).at[:r, :].set(
        params["fc2_w"].reshape(s, r).T.astype(dtype))
    b2 = params["fc2_b"].reshape(1, s).astype(dtype)

    # --- fused SE + softmax + weighting + reversed-branch concat --------------
    out_cl = pl.pallas_call(
        _se_psa_kernel,
        out_shape=jax.ShapeDtypeStruct((btch, 4, hw, s), dtype),
        grid_spec=pltpu.PrefetchScalarGridSpec(
            num_scalar_prefetch=0,
            grid=(btch,),
            in_specs=[pl.BlockSpec((None, hw, s), lambda b: (b, 0, 0))
                      for _ in range(4)]
                     + [pl.BlockSpec((s, r_pad), lambda b: (0, 0)),
                        pl.BlockSpec((1, r_pad), lambda b: (0, 0)),
                        pl.BlockSpec((r_pad, s), lambda b: (0, 0)),
                        pl.BlockSpec((1, s), lambda b: (0, 0))],
            out_specs=pl.BlockSpec((None, 4, hw, s), lambda b: (b, 0, 0, 0)),
        ),
        compiler_params=pltpu.CompilerParams(
            dimension_semantics=("parallel",)),
    )(feats[0], feats[1], feats[2], feats[3], w1, b1, w2, b2)

    # channel-last -> NCHW (glue; disappears if the surrounding net stays NHWC).
    return jnp.transpose(out_cl, (0, 1, 3, 2)).reshape(btch, 4 * s, h, w)


# ---------------------------------------------------------------------------
# Plain-JAX reference (independent path: lax.conv with feature_group_count).
# ---------------------------------------------------------------------------
def psa_reference(x_nchw, params, conv_kernels=(3, 5, 7, 9), conv_groups=(1, 4, 8, 16)):
    s = params["b0"].shape[0]
    r = params["fc1_b"].shape[0]

    def branch(i, k, g):
        y = jax.lax.conv_general_dilated(
            x_nchw, params[f"w{i}"], (1, 1), [(k // 2, k // 2)] * 2,
            dimension_numbers=("NCHW", "OIHW", "NCHW"),
            feature_group_count=g,
            precision=jax.lax.Precision.HIGHEST)
        return y + params[f"b{i}"][None, :, None, None]

    xs = [branch(i, k, g) for i, (k, g) in enumerate(zip(conv_kernels, conv_groups))]

    w1 = params["fc1_w"].reshape(r, s)
    b1 = params["fc1_b"]
    w2 = params["fc2_w"].reshape(s, r)
    b2 = params["fc2_b"]

    def se(xi):
        pooled = xi.mean(axis=(2, 3))                                   # (B, S)
        hdn = jnp.maximum(pooled @ w1.T + b1[None, :], 0.0)
        return 1.0 / (1.0 + jnp.exp(-(hdn @ w2.T + b2[None, :])))       # (B, S)

    att = jax.nn.softmax(jnp.stack([se(xi) for xi in xs], axis=1), axis=1)  # (B,4,S)
    feats = jnp.stack(xs, axis=1)                                       # (B,4,S,H,W)
    fw = feats * att[:, :, :, None, None]
    return jnp.concatenate([fw[:, 3], fw[:, 2], fw[:, 1], fw[:, 0]], axis=1)


if __name__ == "__main__":
    # Small shapes consistent with the module: inplanes must be divisible by all
    # conv_groups (max 16) and planes//4 must be divisible by 16 as well.
    B, Cin, H, W = 2, 16, 16, 16
    planes = 64
    S = planes // 4                      # 16
    conv_kernels = (3, 5, 7, 9)
    conv_groups = (1, 4, 8, 16)
    reduction = 16
    R = max(S // reduction, 1)           # SE hidden dim

    key = jax.random.PRNGKey(0)
    ks = jax.random.split(key, 13)
    x = jax.random.normal(ks[0], (B, Cin, H, W), dtype=jnp.float32)

    params = {}
    for i, (k, g) in enumerate(zip(conv_kernels, conv_groups)):
        params[f"w{i}"] = 0.1 * jax.random.normal(
            ks[1 + i], (S, Cin // g, k, k), dtype=jnp.float32)
        params[f"b{i}"] = 0.1 * jax.random.normal(ks[5 + i], (S,), dtype=jnp.float32)
    params["fc1_w"] = 0.2 * jax.random.normal(ks[9], (R, S, 1, 1), dtype=jnp.float32)
    params["fc1_b"] = 0.2 * jax.random.normal(ks[10], (R,), dtype=jnp.float32)
    params["fc2_w"] = 0.2 * jax.random.normal(ks[11], (S, R, 1, 1), dtype=jnp.float32)
    params["fc2_b"] = 0.2 * jax.random.normal(ks[12], (S,), dtype=jnp.float32)

    out = psa_forward(x, params, conv_kernels, conv_groups)
    out = jax.block_until_ready(out)

    ref = psa_reference(x, params, conv_kernels, conv_groups)
    assert out.shape == (B, planes, H, W), out.shape
    max_err = float(jnp.max(jnp.abs(out - ref)))
    assert max_err < 1e-3, f"max abs error vs reference: {max_err}"

    print("KERNEL_OK")
</pallas_src>

<mosaic_0001>
module attributes {stable_mosaic.version = 11 : i64} {
  func.func @_conv_mm_kernel(%arg0: i32, %arg1: memref<256x144xf32, #tpu.memory_space<vmem>>, %arg2: memref<144x16xf32, #tpu.memory_space<vmem>>, %arg3: memref<1x16xf32, #tpu.memory_space<vmem>>, %arg4: memref<256x16xf32, #tpu.memory_space<vmem>>) attributes {dimension_semantics = [#tpu.dimension_semantics<parallel>], iteration_bounds = array<i64: 2>, scalar_prefetch = 0 : i64, scratch_operands = 0 : i64, tpu.core_type = #tpu.core_type<tc>, window_params = [{transform_indices = @transform_0, window_bounds = array<i64: 256, 144>}, {pipeline_mode = #tpu.pipeline_mode<synchronous>, transform_indices = @transform_1, window_bounds = array<i64: 144, 16>}, {pipeline_mode = #tpu.pipeline_mode<synchronous>, transform_indices = @transform_2, window_bounds = array<i64: 1, 16>}, {transform_indices = @transform_3, window_bounds = array<i64: 256, 16>}]} {
    %c0 = arith.constant 0 : index
    %c0_0 = arith.constant 0 : index
    %0 = vector.load %arg1[%c0, %c0_0] : memref<256x144xf32, #tpu.memory_space<vmem>>, vector<256x144xf32>
    %c0_1 = arith.constant 0 : index
    %c0_2 = arith.constant 0 : index
    %1 = vector.load %arg2[%c0_1, %c0_2] : memref<144x16xf32, #tpu.memory_space<vmem>>, vector<144x16xf32>
    %cst = arith.constant dense<0.000000e+00> : vector<256x16xf32>
    %2 = tpu.matmul %0, %1, %cst {dimension_numbers = #tpu.dot_dimension_numbers<[1], [0], [0], [1], [0, 0, 1, 1], [], []>} : vector<256x144xf32>, vector<144x16xf32>, vector<256x16xf32> -> vector<256x16xf32>
    %c0_3 = arith.constant 0 : index
    %c0_4 = arith.constant 0 : index
    %3 = vector.load %arg3[%c0_3, %c0_4] : memref<1x16xf32, #tpu.memory_space<vmem>>, vector<1x16xf32>
    %4 = vector.broadcast %3 : vector<1x16xf32> to vector<256x16xf32>
    %5 = arith.addf %2, %4 : vector<256x16xf32>
    %c0_5 = arith.constant 0 : index
    %c0_6 = arith.constant 0 : index
    %6 = vector.load %arg4[%c0_5, %c0_6] : memref<256x16xf32, #tpu.memory_space<vmem>>, vector<256x16xf32>
    tpu.vector_store %arg4[%c0_5, %c0_6], %5 {strides = array<i32>} : memref<256x16xf32, #tpu.memory_space<vmem>>, vector<256x16xf32>,
    return
  }
  func.func @transform_0(%arg0: i32) -> (i32, i32) {
    %c0_i32 = arith.constant 0 : i32
    %c0_i32_0 = arith.constant 0 : i32
    return %arg0, %c0_i32 : i32, i32
  }
  func.func @transform_1(%arg0: i32) -> (i32, i32) {
    %c0_i32 = arith.constant 0 : i32
    %c0_i32_0 = arith.constant 0 : i32
    %c0_i32_1 = arith.constant 0 : i32
    return %c0_i32, %c0_i32_0 : i32, i32
  }
  func.func @transform_2(%arg0: i32) -> (i32, i32) {
    %c0_i32 = arith.constant 0 : i32
    %c0_i32_0 = arith.constant 0 : i32
    %c0_i32_1 = arith.constant 0 : i32
    return %c0_i32, %c0_i32_0 : i32, i32
  }
  func.func @transform_3(%arg0: i32) -> (i32, i32) {
    %c0_i32 = arith.constant 0 : i32
    %c0_i32_0 = arith.constant 0 : i32
    return %arg0, %c0_i32 : i32, i32
  }
}

</mosaic_0001>

<bundles_post_ra>
// kernel: tpu_custom_call.1
= control target key start
LH: loop header
LB: loop body
LE: loop exit
PB: predicated region body
PF: predicated region fallthrough
CT: control target
= control target key end

     0   :  { %s805_s12 = smov 0   ;;  %s1099_s0 = inlined_call_operand.vmem [shape: f32[512,144], index: 0, kind: input, shape index: {}]   ;;  %s1100_s1 = inlined_call_operand.vmem [shape: f32[144,16], index: 1, kind: input, shape index: {}]   ;;  %s1101_s2 = inlined_call_operand.vmem [shape: f32[1,16], index: 2, kind: input, shape index: {}]   ;;  %s1102_s3 = inlined_call_operand.vmem [shape: f32[512,16], index: 3, kind: output, shape index: {}]  }
   0x1 LB: > { %s676_s13 = sadd.s32 4294967295, %s782_s12   ;;  %p680_p0 = scmp.ge.s32.totalorder %s782_s12, 1  ;;  %s782_s12 = sphi %s805_s12, %s13_s12  }
   0x2   : > { %p139_p1 = scmp.lt.s32.totalorder %s782_s12, 3 }
   0x4   : > { %p140_p2 = pnand %p680_p0, %p139_p1 }
   0x5   : > { %v241_v0 = vld [vmem:[%s1100_s1] sm:$0xff] (!%p140_p2)  ;;  %v242_v1 = vld [vmem:[%s1100_s1 + $0x8] sm:$0xff] (!%p140_p2)  ;;  %v243_v2 = vld [vmem:[%s1100_s1 + $0x10] sm:$0xff] (!%p140_p2)  ;;  %s681_s20 = sshll.u32 (!%p140_p2), %s676_s13, 5  ;;  %v784_v3 = vmov (!%p140_p2), 0.0|0.0   ;;  %vm266_vm0 = vcmask (!%p140_p2), 130048  }
   0x6   : > { %143 = sbr.rel (%p140_p2) target bundleno = 318 (0x13e), region = 32  ;;  %722 = vmatprep.subr.bf16.mxu0 (!%p140_p2), %v784_v3  ;;  %749 = vmatprep.subr.bf16.mxu1 (!%p140_p2), %v784_v3  ;;  %v723_v4 = vpack.c.bf16 (!%p140_p2), %v242_v1, %v241_v0  ;;  %v244_v5 = vld [vmem:[%s1100_s1 + $0x18] sm:$0xff] (!%p140_p2)  ;;  %p165_p3 = scmp.lt.s32.totalorder (!%p140_p2), %s681_s20, 63  ;;  %v245_v7 = vld [vmem:[%s1100_s1 + $0x20] sm:$0xff] (!%p140_p2)  ;;  %v246_v8 = vld [vmem:[%s1100_s1 + $0x28] sm:$0xff] (!%p140_p2) }
   0x7   : > { %v726_v6 = vpack.c.bf16 (!%p140_p2), %v244_v5, %v243_v2  ;;  %v729_v9 = vpack.c.bf16 (!%p140_p2), %v246_v8, %v245_v7  ;;  %v247_v12 = vld [vmem:[%s1100_s1 + $0x30] sm:$0xff] (!%p140_p2)  ;;  %v248_v13 = vld [vmem:[%s1100_s1 + $0x38] sm:$0xff] (!%p140_p2)  ;;  %v249_v15 = vld [vmem:[%s1100_s1 + $0x40] sm:$0xff] (!%p140_p2) }
   0x8   : > { %724 = vmatpush1.bf16.msra.mxu0 (!%p140_p2), %v723_v4  ;;  %758 = vmatpush1.bf16.msra.mxu1 (!%p140_p2), %v723_v4  ;;  %v732_v14 = vpack.c.bf16 (!%p140_p2), %v248_v13, %v247_v12  ;;  %v250_v16 = vld [vmem:[%s1100_s1 + $0x48] sm:$0xff] (!%p140_p2)  ;;  %v251_v18 = vld [vmem:[%s1100_s1 + $0x50] sm:$0xff] (!%p140_p2)  ;;  %v252_v19 = vld [vmem:[%s1100_s1 + $0x58] sm:$0xff] (!%p140_p2) }
   0x9   : > { %725 = vmatprep.subr.bf16.mxu0 (!%p140_p2), %v784_v3  ;;  %750 = vmatprep.subr.bf16.mxu1 (!%p140_p2), %v784_v3  ;;  %v735_v17 = vpack.c.bf16 (!%p140_p2), %v250_v16, %v249_v15  ;;  %v738_v20 = vpack.c.bf16 (!%p140_p2), %v252_v19, %v251_v18  ;;  %v253_v21 = vld [vmem:[%s1100_s1 + $0x60] sm:$0xff] (!%p140_p2)  ;;  %v254_v22 = vld [vmem:[%s1100_s1 + $0x68] sm:$0xff] (!%p140_p2)  ;;  %v255_v24 = vld [vmem:[%s1100_s1 + $0x70] sm:$0xff] (!%p140_p2) }
   0xa   : > { %v741_v23 = vpack.c.bf16 (!%p140_p2), %v254_v22, %v253_v21  ;;  %v256_v25 = vld [vmem:[%s1100_s1 + $0x78] sm:$0xff] (!%p140_p2)  ;;  %v257_v27 = vld [vmem:[%s1100_s1 + $0x80] sm:$0xff] (!%p140_p2)  ;;  %v258_v28 = vld [vmem:[%s1100_s1 + $0x88] sm:$0xff] (!%p140_p2) }
   0xb   : > { %v744_v26 = vpack.c.bf16 (!%p140_p2), %v256_v25, %v255_v24  ;;  %v747_v29 = vpack.c.bf16 (!%p140_p2), %v258_v28, %v257_v27  ;;  %v993_v28 = vld [vmem:[%s1101_s2] ss:$0 sm:$0xff] (!%p140_p2) }
   0xc   : > { %727 = vmatpush1.bf16.msra.mxu0 (!%p140_p2), %v726_v6  ;;  %759 = vmatpush1.bf16.msra.mxu1 (!%p140_p2), %v726_v6 }
   0xd   : > { %s1104_s20 = smov (!%p165_p3, %s681_s20), 63  ;;  %728 = vmatprep.subr.bf16.mxu0 %v784_v3  ;;  %751 = vmatprep.subr.bf16.mxu1 %v784_v3 }
   0xe   : > { %s721_s27 = sshll.u32 %s1104_s20, 4  ;;  %s685_s4 = sshll.u32 %s1104_s20, 3 }
   0xf   : > { %s841_s30 = scalar_lea.vmem %s1099_s0, %s721_s27  ;;  %s998_s9 = scalar_lea.vmem %s1102_s3, %s685_s4 }
  0x10   : > { %v178_v10 = vld [vmem:[%s841_s30 + $0x8] sm:$0xff]  ;;  %730 = vmatpush1.bf16.msra.mxu0 %v729_v9  ;;  %760 = vmatpush1.bf16.msra.mxu1 %v729_v9  ;;  %v177_v30 = vld [vmem:[%s841_s30] sm:$0xff]  ;;  %v180_v32 = vld [vmem:[%s841_s30 + $0x18] sm:$0xff] }
  0x11   : > { %v210_v11 = vld [vmem:[%s841_s30 + $0x108] sm:$0xff]  ;;  %687 = vmatprep.mubr.msk.f32.mxu0 %vm266_vm0, %v178_v10  ;;  %731 = vmatprep.subr.bf16.mxu0 %v784_v3  ;;  %v209_v31 = vld [vmem:[%s841_s30 + $0x100] sm:$0xff]  ;;  %v212_v33 = vld [vmem:[%s841_s30 + $0x118] sm:$0xff] }
  0x12   : > { %703 = vmatprep.mubr.msk.f32.mxu1 %vm266_vm0, %v210_v11  ;;  %752 = vmatprep.subr.bf16.mxu1 %v784_v3  ;;  %v179_v34 = vld [vmem:[%s841_s30 + $0x10] sm:$0xff]  ;;  %v182_v36 = vld [vmem:[%s841_s30 + $0x28] sm:$0xff]  ;;  %v181_v38 = vld [vmem:[%s841_s30 + $0x20] sm:$0xff] }
  0x13   : > { %v211_v35 = vld [vmem:[%s841_s30 + $0x110] sm:$0xff]  ;;  %v214_v37 = vld [vmem:[%s841_s30 + $0x128] sm:$0xff]  ;;  %v213_v39 = vld [vmem:[%s841_s30 + $0x120] sm:$0xff] }
  0x14   : > { %733 = vmatpush1.bf16.msra.mxu0 %v732_v14  ;;  %761 = vmatpush1.bf16.msra.mxu1 %v732_v14  ;;  %v184_v40 = vld [vmem:[%s841_s30 + $0x38] sm:$0xff]  ;;  %v183_v42 = vld [vmem:[%s841_s30 + $0x30] sm:$0xff]  ;;  %v186_v44 = vld [vmem:[%s841_s30 + $0x48] sm:$0xff] }
  0x15   : > { %734 = vmatprep.subr.bf16.mxu0 %v784_v3  ;;  %753 = vmatprep.subr.bf16.mxu1 %v784_v3  ;;  %v216_v41 = vld [vmem:[%s841_s30 + $0x138] sm:$0xff]  ;;  %v215_v43 = vld [vmem:[%s841_s30 + $0x130] sm:$0xff]  ;;  %v218_v45 = vld [vmem:[%s841_s30 + $0x148] sm:$0xff] }
  0x16   : > { %v185_v46 = vld [vmem:[%s841_s30 + $0x40] sm:$0xff]  ;;  %v188_v48 = vld [vmem:[%s841_s30 + $0x58] sm:$0xff]  ;;  %v187_v50 = vld [vmem:[%s841_s30 + $0x50] sm:$0xff] }
  0x17   : > { %v217_v47 = vld [vmem:[%s841_s30 + $0x140] sm:$0xff]  ;;  %v220_v49 = vld [vmem:[%s841_s30 + $0x158] sm:$0xff]  ;;  %v219_v51 = vld [vmem:[%s841_s30 + $0x150] sm:$0xff] }
  0x18   : > { %736 = vmatpush1.bf16.msra.mxu0 %v735_v17  ;;  %762 = vmatpush1.bf16.msra.mxu1 %v735_v17  ;;  %v190_v52 = vld [vmem:[%s841_s30 + $0x68] sm:$0xff]  ;;  %v189_v54 = vld [vmem:[%s841_s30 + $0x60] sm:$0xff]  ;;  %v192_v56 = vld [vmem:[%s841_s30 + $0x78] sm:$0xff] }
  0x19   : > { %737 = vmatprep.subr.bf16.mxu0 %v784_v3  ;;  %754 = vmatprep.subr.bf16.mxu1 %v784_v3  ;;  %v222_v53 = vld [vmem:[%s841_s30 + $0x168] sm:$0xff]  ;;  %v221_v55 = vld [vmem:[%s841_s30 + $0x160] sm:$0xff]  ;;  %v224_v57 = vld [vmem:[%s841_s30 + $0x178] sm:$0xff] }
  0x1a   : > { %v191_v58 = vld [vmem:[%s841_s30 + $0x70] sm:$0xff]  ;;  %v194_v60 = vld [vmem:[%s841_s30 + $0x88] sm:$0xff]  ;;  %v193_v62 = vld [vmem:[%s841_s30 + $0x80] sm:$0xff] }
  0x1b   : > { %v223_v59 = vld [vmem:[%s841_s30 + $0x170] sm:$0xff]  ;;  %v226_v61 = vld [vmem:[%s841_s30 + $0x188] sm:$0xff]  ;;  %v225_v63 = vld [vmem:[%s841_s30 + $0x180] sm:$0xff] }
  0x1c   : > { %739 = vmatpush1.bf16.msra.mxu0 %v738_v20  ;;  %763 = vmatpush1.bf16.msra.mxu1 %v738_v20  ;;  %v196_v0 = vld [vmem:[%s841_s30 + $0x98] sm:$0xff]  ;;  %v195_v2 = vld [vmem:[%s841_s30 + $0x90] sm:$0xff]  ;;  %v198_v4 = vld [vmem:[%s841_s30 + $0xa8] sm:$0xff] }
  0x1d   : > { %740 = vmatprep.subr.bf16.mxu0 %v784_v3  ;;  %755 = vmatprep.subr.bf16.mxu1 %v784_v3  ;;  %v228_v1 = vld [vmem:[%s841_s30 + $0x198] sm:$0xff]  ;;  %v230_v5 = vld [vmem:[%s841_s30 + $0x1a8] sm:$0xff]  ;;  %v197_v6 = vld [vmem:[%s841_s30 + $0xa0] sm:$0xff] }
  0x1e   : > { %v229_v7 = vld [vmem:[%s841_s30 + $0x1a0] sm:$0xff]  ;;  %v200_v8 = vld [vmem:[%s841_s30 + $0xb8] sm:$0xff]  ;;  %v199_v10 = vld [vmem:[%s841_s30 + $0xb0] sm:$0xff] }
  0x1f   : > { %v232_v9 = vld [vmem:[%s841_s30 + $0x1b8] sm:$0xff]  ;;  %v231_v11 = vld [vmem:[%s841_s30 + $0x1b0] sm:$0xff]  ;;  %v202_v12 = vld [vmem:[%s841_s30 + $0xc8] sm:$0xff] }
  0x20   : > { %742 = vmatpush1.bf16.msra.mxu0 %v741_v23  ;;  %764 = vmatpush1.bf16.msra.mxu1 %v741_v23  ;;  %v234_v13 = vld [vmem:[%s841_s30 + $0x1c8] sm:$0xff]  ;;  %v201_v14 = vld [vmem:[%s841_s30 + $0xc0] sm:$0xff]  ;;  %v204_v16 = vld [vmem:[%s841_s30 + $0xd8] sm:$0xff] }
  0x21   : > { %743 = vmatprep.subr.bf16.mxu0 %v784_v3  ;;  %756 = vmatprep.subr.bf16.mxu1 %v784_v3  ;;  %v233_v15 = vld [vmem:[%s841_s30 + $0x1c0] sm:$0xff]  ;;  %v236_v17 = vld [vmem:[%s841_s30 + $0x1d8] sm:$0xff]  ;;  %v203_v18 = vld [vmem:[%s841_s30 + $0xd0] sm:$0xff] }
  0x22   : > { %v235_v19 = vld [vmem:[%s841_s30 + $0x1d0] sm:$0xff]  ;;  %v206_v20 = vld [vmem:[%s841_s30 + $0xe8] sm:$0xff]  ;;  %v205_v22 = vld [vmem:[%s841_s30 + $0xe0] sm:$0xff] }
  0x23   : > { %v238_v21 = vld [vmem:[%s841_s30 + $0x1e8] sm:$0xff]  ;;  %v237_v23 = vld [vmem:[%s841_s30 + $0x1e0] sm:$0xff]  ;;  %v208_v24 = vld [vmem:[%s841_s30 + $0xf8] sm:$0xff] }
  0x24   : > { %745 = vmatpush1.bf16.msra.mxu0 %v744_v26  ;;  %765 = vmatpush1.bf16.msra.mxu1 %v744_v26  ;;  %v240_v25 = vld [vmem:[%s841_s30 + $0x1f8] sm:$0xff]  ;;  %v207_v26 = vld [vmem:[%s841_s30 + $0xf0] sm:$0xff] }
  0x25   : > { %746 = vmatprep.subr.bf16.mxu0 %v784_v3  ;;  %757 = vmatprep.subr.bf16.mxu1 %v784_v3  ;;  %v227_v3 = vld [vmem:[%s841_s30 + $0x190] sm:$0xff] }
  0x26   : > { %v239_v27 = vld [vmem:[%s841_s30 + $0x1f0] sm:$0xff] }
  0x28   : > { %748 = vmatpush1.bf16.msra.mxu0 %v747_v29  ;;  %766 = vmatpush1.bf16.msra.mxu1 %v747_v29 }
  0x2b   : > { %428 = vmatmul.mubr.f32.vlgmr.msra.gmra.mrb[0].mxu0 %v177_v30  ;;  %508 = vmatmul.mubr.f32.vlgmr.msra.gmra.mrb[0].mxu1 %v209_v31 }
  0x2c   : > { %688 = vmatprep.mubr.msk.f32.mxu0 %vm266_vm0, %v180_v32  ;;  %704 = vmatprep.mubr.msk.f32.mxu1 %vm266_vm0, %v212_v33 }
  0x2f   : > { %433 = vmatmul.mubr.f32.gmra.mrb[2].mxu0 %v179_v34  ;;  %513 = vmatmul.mubr.f32.gmra.mrb[2].mxu1 %v211_v35 }
  0x30   : > { %689 = vmatprep.mubr.msk.f32.mxu0 %vm266_vm0, %v182_v36  ;;  %705 = vmatprep.mubr.msk.f32.mxu1 %vm266_vm0, %v214_v37 }
  0x33   : > { %438 = vmatmul.mubr.f32.gmra.mrb[4].mxu0 %v181_v38  ;;  %518 = vmatmul.mubr.f32.gmra.mrb[4].mxu1 %v213_v39 }
  0x34   : > { %690 = vmatprep.mubr.msk.f32.mxu0 %vm266_vm0, %v184_v40  ;;  %706 = vmatprep.mubr.msk.f32.mxu1 %vm266_vm0, %v216_v41 }
  0x37   : > { %443 = vmatmul.mubr.f32.gmra.mrb[6].mxu0 %v183_v42  ;;  %523 = vmatmul.mubr.f32.gmra.mrb[6].mxu1 %v215_v43 }
  0x38   : > { %691 = vmatprep.mubr.msk.f32.mxu0 %vm266_vm0, %v186_v44  ;;  %707 = vmatprep.mubr.msk.f32.mxu1 %vm266_vm0, %v218_v45 }
  0x3b   : > { %448 = vmatmul.mubr.f32.gmra.mrb[8].mxu0 %v185_v46  ;;  %528 = vmatmul.mubr.f32.gmra.mrb[8].mxu1 %v217_v47 }
  0x3c   : > { %692 = vmatprep.mubr.msk.f32.mxu0 %vm266_vm0, %v188_v48  ;;  %708 = vmatprep.mubr.msk.f32.mxu1 %vm266_vm0, %v220_v49 }
  0x3f   : > { %453 = vmatmul.mubr.f32.gmra.mrb[10].mxu0 %v187_v50  ;;  %533 = vmatmul.mubr.f32.gmra.mrb[10].mxu1 %v219_v51 }
  0x40   : > { %693 = vmatprep.mubr.msk.f32.mxu0 %vm266_vm0, %v190_v52  ;;  %709 = vmatprep.mubr.msk.f32.mxu1 %vm266_vm0, %v222_v53 }
  0x43   : > { %458 = vmatmul.mubr.f32.gmra.mrb[12].mxu0 %v189_v54  ;;  %538 = vmatmul.mubr.f32.gmra.mrb[12].mxu1 %v221_v55 }
  0x44   : > { %694 = vmatprep.mubr.msk.f32.mxu0 %vm266_vm0, %v192_v56  ;;  %710 = vmatprep.mubr.msk.f32.mxu1 %vm266_vm0, %v224_v57 }
  0x47   : > { %463 = vmatmul.mubr.f32.gmra.mrb[14].mxu0 %v191_v58  ;;  %543 = vmatmul.mubr.f32.gmra.mrb[14].mxu1 %v223_v59 }
  0x48   : > { %695 = vmatprep.mubr.msk.f32.mxu0 %vm266_vm0, %v194_v60  ;;  %711 = vmatprep.mubr.msk.f32.mxu1 %vm266_vm0, %v226_v61 }
  0x4b   : > { %468 = vmatmul.mubr.f32.gmra.mrb[16].mxu0 %v193_v62  ;;  %548 = vmatmul.mubr.f32.gmra.mrb[16].mxu1 %v225_v63 }
  0x4c   : > { %696 = vmatprep.mubr.msk.f32.mxu0 %vm266_vm0, %v196_v0  ;;  %712 = vmatprep.mubr.msk.f32.mxu1 %vm266_vm0, %v228_v1 }
  0x4f   : > { %473 = vmatmul.mubr.f32.gmra.mrb[18].mxu0 %v195_v2  ;;  %553 = vmatmul.mubr.f32.gmra.mrb[18].mxu1 %v227_v3 }
  0x50   : > { %697 = vmatprep.mubr.msk.f32.mxu0 %vm266_vm0, %v198_v4  ;;  %713 = vmatprep.mubr.msk.f32.mxu1 %vm266_vm0, %v230_v5 }
  0x53   : > { %478 = vmatmul.mubr.f32.gmra.mrb[20].mxu0 %v197_v6  ;;  %558 = vmatmul.mubr.f32.gmra.mrb[20].mxu1 %v229_v7 }
  0x54   : > { %698 = vmatprep.mubr.msk.f32.mxu0 %vm266_vm0, %v200_v8  ;;  %714 = vmatprep.mubr.msk.f32.mxu1 %vm266_vm0, %v232_v9 }
  0x57   : > { %483 = vmatmul.mubr.f32.gmra.mrb[22].mxu0 %v199_v10  ;;  %563 = vmatmul.mubr.f32.gmra.mrb[22].mxu1 %v231_v11 }
  0x58   : > { %699 = vmatprep.mubr.msk.f32.mxu0 %vm266_vm0, %v202_v12  ;;  %715 = vmatprep.mubr.msk.f32.mxu1 %vm266_vm0, %v234_v13 }
  0x5b   : > { %488 = vmatmul.mubr.f32.gmra.mrb[24].mxu0 %v201_v14  ;;  %568 = vmatmul.mubr.f32.gmra.mrb[24].mxu1 %v233_v15 }
  0x5c   : > { %700 = vmatprep.mubr.msk.f32.mxu0 %vm266_vm0, %v204_v16  ;;  %716 = vmatprep.mubr.msk.f32.mxu1 %vm266_vm0, %v236_v17 }
  0x5f   : > { %493 = vmatmul.mubr.f32.gmra.mrb[26].mxu0 %v203_v18  ;;  %573 = vmatmul.mubr.f32.gmra.mrb[26].mxu1 %v235_v19 }
  0x60   : > { %701 = vmatprep.mubr.msk.f32.mxu0 %vm266_vm0, %v206_v20  ;;  %717 = vmatprep.mubr.msk.f32.mxu1 %vm266_vm0, %v238_v21 }
  0x63   : > { %498 = vmatmul.mubr.f32.gmra.mrb[28].mxu0 %v205_v22  ;;  %578 = vmatmul.mubr.f32.gmra.mrb[28].mxu1 %v237_v23 }
  0x64   : > { %702 = vmatprep.mubr.msk.f32.mxu0 %vm266_vm0, %v208_v24  ;;  %718 = vmatprep.mubr.msk.f32.mxu1 %vm266_vm0, %v240_v25 }
  0x67   : > { %503 = vmatmul.mubr.f32.gmra.mrb[30].mxu0 %v207_v26  ;;  %583 = vmatmul.mubr.f32.gmra.mrb[30].mxu1 %v239_v27 }
  0xfe   : > { %v429_v29 = vpop.f32.mrb[0].mxu0  ;;  %v509_v30 = vpop.f32.mrb[0].mxu1 }
  0xff   : > { %v430_v31 = vadd.f32 %v993_v28, %v429_v29  ;;  %v510_v32 = vadd.f32 %v993_v28, %v509_v30  ;;  %v431_v33 = vpop.f32.mrb[1].mxu0  ;;  %v511_v34 = vpop.f32.mrb[1].mxu1 }
 0x101   : > { %588 = vst.msk [vmem:[%s998_s9] sm:$0xff] %vm266_vm0, %v430_v31  ;;  %604 = vst.msk [vmem:[%s998_s9 + $0x80] sm:$0xff] %vm266_vm0, %v510_v32 }
 0x102   : > { %v434_v35 = vpop.f32.mrb[2].mxu0  ;;  %v514_v36 = vpop.f32.mrb[2].mxu1 }
 0x103   : > { %v435_v37 = vadd.f32 %v993_v28, %v434_v35  ;;  %v515_v38 = vadd.f32 %v993_v28, %v514_v36  ;;  %v436_v39 = vpop.f32.mrb[3].mxu0  ;;  %v516_v40 = vpop.f32.mrb[3].mxu1 }
 0x105   : > { %589 = vst.msk [vmem:[%s998_s9 + $0x8] sm:$0xff] %vm266_vm0, %v435_v37  ;;  %605 = vst.msk [vmem:[%s998_s9 + $0x88] sm:$0xff] %vm266_vm0, %v515_v38 }
 0x106   : > { %v439_v41 = vpop.f32.mrb[4].mxu0  ;;  %v519_v42 = vpop.f32.mrb[4].mxu1 }
 0x107   : > { %v440_v43 = vadd.f32 %v993_v28, %v439_v41  ;;  %v520_v44 = vadd.f32 %v993_v28, %v519_v42  ;;  %v441_v45 = vpop.f32.mrb[5].mxu0  ;;  %v521_v46 = vpop.f32.mrb[5].mxu1 }
 0x109   : > { %590 = vst.msk [vmem:[%s998_s9 + $0x10] sm:$0xff] %vm266_vm0, %v440_v43  ;;  %606 = vst.msk [vmem:[%s998_s9 + $0x90] sm:$0xff] %vm266_vm0, %v520_v44 }
 0x10a   : > { %v444_v47 = vpop.f32.mrb[6].mxu0  ;;  %v524_v48 = vpop.f32.mrb[6].mxu1 }
 0x10b   : > { %v445_v49 = vadd.f32 %v993_v28, %v444_v47  ;;  %v525_v50 = vadd.f32 %v993_v28, %v524_v48  ;;  %v446_v51 = vpop.f32.mrb[7].mxu0  ;;  %v526_v52 = vpop.f32.mrb[7].mxu1 }
 0x10d   : > { %591 = vst.msk [vmem:[%s998_s9 + $0x18] sm:$0xff] %vm266_vm0, %v445_v49  ;;  %607 = vst.msk [vmem:[%s998_s9 + $0x98] sm:$0xff] %vm266_vm0, %v525_v50 }
 0x10e   : > { %v449_v53 = vpop.f32.mrb[8].mxu0  ;;  %v529_v54 = vpop.f32.mrb[8].mxu1 }
 0x10f   : > { %v450_v55 = vadd.f32 %v993_v28, %v449_v53  ;;  %v530_v56 = vadd.f32 %v993_v28, %v529_v54  ;;  %v451_v57 = vpop.f32.mrb[9].mxu0  ;;  %v531_v58 = vpop.f32.mrb[9].mxu1 }
 0x111   : > { %592 = vst.msk [vmem:[%s998_s9 + $0x20] sm:$0xff] %vm266_vm0, %v450_v55  ;;  %608 = vst.msk [vmem:[%s998_s9 + $0xa0] sm:$0xff] %vm266_vm0, %v530_v56 }
 0x112   : > { %v454_v59 = vpop.f32.mrb[10].mxu0  ;;  %v534_v60 = vpop.f32.mrb[10].mxu1 }
 0x113   : > { %v455_v61 = vadd.f32 %v993_v28, %v454_v59  ;;  %v535_v62 = vadd.f32 %v993_v28, %v534_v60  ;;  %v456_v63 = vpop.f32.mrb[11].mxu0  ;;  %v536_v0 = vpop.f32.mrb[11].mxu1 }
 0x115   : > { %593 = vst.msk [vmem:[%s998_s9 + $0x28] sm:$0xff] %vm266_vm0, %v455_v61  ;;  %609 = vst.msk [vmem:[%s998_s9 + $0xa8] sm:$0xff] %vm266_vm0, %v535_v62 }
 0x116   : > { %v459_v1 = vpop.f32.mrb[12].mxu0  ;;  %v539_v2 = vpop.f32.mrb[12].mxu1 }
 0x117   : > { %v460_v3 = vadd.f32 %v993_v28, %v459_v1  ;;  %v540_v4 = vadd.f32 %v993_v28, %v539_v2  ;;  %v461_v5 = vpop.f32.mrb[13].mxu0  ;;  %v541_v6 = vpop.f32.mrb[13].mxu1 }
 0x119   : > { %594 = vst.msk [vmem:[%s998_s9 + $0x30] sm:$0xff] %vm266_vm0, %v460_v3  ;;  %610 = vst.msk [vmem:[%s998_s9 + $0xb0] sm:$0xff] %vm266_vm0, %v540_v4 }
 0x11a   : > { %v464_v7 = vpop.f32.mrb[14].mxu0  ;;  %v544_v8 = vpop.f32.mrb[14].mxu1 }
 0x11b   : > { %v465_v9 = vadd.f32 %v993_v28, %v464_v7  ;;  %v545_v10 = vadd.f32 %v993_v28, %v544_v8  ;;  %v466_v11 = vpop.f32.mrb[15].mxu0  ;;  %v546_v12 = vpop.f32.mrb[15].mxu1 }
 0x11d   : > { %595 = vst.msk [vmem:[%s998_s9 + $0x38] sm:$0xff] %vm266_vm0, %v465_v9  ;;  %611 = vst.msk [vmem:[%s998_s9 + $0xb8] sm:$0xff] %vm266_vm0, %v545_v10 }
 0x11e   : > { %v469_v13 = vpop.f32.mrb[16].mxu0  ;;  %v549_v14 = vpop.f32.mrb[16].mxu1 }
 0x11f   : > { %v470_v15 = vadd.f32 %v993_v28, %v469_v13  ;;  %v550_v16 = vadd.f32 %v993_v28, %v549_v14  ;;  %v471_v17 = vpop.f32.mrb[17].mxu0  ;;  %v551_v18 = vpop.f32.mrb[17].mxu1 }
 0x121   : > { %596 = vst.msk [vmem:[%s998_s9 + $0x40] sm:$0xff] %vm266_vm0, %v470_v15  ;;  %612 = vst.msk [vmem:[%s998_s9 + $0xc0] sm:$0xff] %vm266_vm0, %v550_v16 }
 0x122   : > { %v474_v19 = vpop.f32.mrb[18].mxu0  ;;  %v554_v20 = vpop.f32.mrb[18].mxu1 }
 0x123   : > { %v475_v21 = vadd.f32 %v993_v28, %v474_v19  ;;  %v555_v22 = vadd.f32 %v993_v28, %v554_v20  ;;  %v476_v23 = vpop.f32.mrb[19].mxu0  ;;  %v556_v24 = vpop.f32.mrb[19].mxu1 }
 0x125   : > { %597 = vst.msk [vmem:[%s998_s9 + $0x48] sm:$0xff] %vm266_vm0, %v475_v21  ;;  %613 = vst.msk [vmem:[%s998_s9 + $0xc8] sm:$0xff] %vm266_vm0, %v555_v22 }
 0x126   : > { %v479_v25 = vpop.f32.mrb[20].mxu0  ;;  %v559_v26 = vpop.f32.mrb[20].mxu1 }
 0x127   : > { %v480_v27 = vadd.f32 %v993_v28, %v479_v25  ;;  %v560_v29 = vadd.f32 %v993_v28, %v559_v26  ;;  %v481_v30 = vpop.f32.mrb[21].mxu0  ;;  %v561_v31 = vpop.f32.mrb[21].mxu1 }
 0x129   : > { %598 = vst.msk [vmem:[%s998_s9 + $0x50] sm:$0xff] %vm266_vm0, %v480_v27  ;;  %614 = vst.msk [vmem:[%s998_s9 + $0xd0] sm:$0xff] %vm266_vm0, %v560_v29 }
 0x12a   : > { %v484_v32 = vpop.f32.mrb[22].mxu0  ;;  %v564_v33 = vpop.f32.mrb[22].mxu1 }
 0x12b   : > { %v485_v34 = vadd.f32 %v993_v28, %v484_v32  ;;  %v565_v35 = vadd.f32 %v993_v28, %v564_v33  ;;  %v486_v36 = vpop.f32.mrb[23].mxu0  ;;  %v566_v37 = vpop.f32.mrb[23].mxu1 }
 0x12d   : > { %599 = vst.msk [vmem:[%s998_s9 + $0x58] sm:$0xff] %vm266_vm0, %v485_v34  ;;  %615 = vst.msk [vmem:[%s998_s9 + $0xd8] sm:$0xff] %vm266_vm0, %v565_v35 }
 0x12e   : > { %v489_v38 = vpop.f32.mrb[24].mxu0  ;;  %v569_v39 = vpop.f32.mrb[24].mxu1 }
 0x12f   : > { %v490_v40 = vadd.f32 %v993_v28, %v489_v38  ;;  %v570_v41 = vadd.f32 %v993_v28, %v569_v39  ;;  %v491_v42 = vpop.f32.mrb[25].mxu0  ;;  %v571_v43 = vpop.f32.mrb[25].mxu1 }
 0x131   : > { %600 = vst.msk [vmem:[%s998_s9 + $0x60] sm:$0xff] %vm266_vm0, %v490_v40  ;;  %616 = vst.msk [vmem:[%s998_s9 + $0xe0] sm:$0xff] %vm266_vm0, %v570_v41 }
 0x132   : > { %v494_v44 = vpop.f32.mrb[26].mxu0  ;;  %v574_v45 = vpop.f32.mrb[26].mxu1 }
 0x133   : > { %v495_v46 = vadd.f32 %v993_v28, %v494_v44  ;;  %v575_v47 = vadd.f32 %v993_v28, %v574_v45  ;;  %v496_v48 = vpop.f32.mrb[27].mxu0  ;;  %v576_v49 = vpop.f32.mrb[27].mxu1 }
 0x135   : > { %601 = vst.msk [vmem:[%s998_s9 + $0x68] sm:$0xff] %vm266_vm0, %v495_v46  ;;  %617 = vst.msk [vmem:[%s998_s9 + $0xe8] sm:$0xff] %vm266_vm0, %v575_v47 }
 0x136   : > { %v499_v50 = vpop.f32.mrb[28].mxu0  ;;  %v579_v51 = vpop.f32.mrb[28].mxu1 }
 0x137   : > { %v500_v52 = vadd.f32 %v993_v28, %v499_v50  ;;  %v580_v53 = vadd.f32 %v993_v28, %v579_v51  ;;  %v501_v54 = vpop.f32.mrb[29].mxu0  ;;  %v581_v55 = vpop.f32.mrb[29].mxu1 }
 0x139   : > { %602 = vst.msk [vmem:[%s998_s9 + $0x70] sm:$0xff] %vm266_vm0, %v500_v52  ;;  %618 = vst.msk [vmem:[%s998_s9 + $0xf0] sm:$0xff] %vm266_vm0, %v580_v53 }
 0x13a   : > { %v504_v56 = vpop.f32.mrb[30].mxu0  ;;  %v584_v57 = vpop.f32.mrb[30].mxu1 }
 0x13b   : > { %v505_v58 = vadd.f32 %v993_v28, %v504_v56  ;;  %v585_v59 = vadd.f32 %v993_v28, %v584_v57  ;;  %v506_v60 = vpop.f32.mrb[31].mxu0  ;;  %v586_v61 = vpop.f32.mrb[31].mxu1 }
 0x13d   : > { %603 = vst.msk [vmem:[%s998_s9 + $0x78] sm:$0xff] %vm266_vm0, %v505_v58  ;;  %619 = vst.msk [vmem:[%s998_s9 + $0xf8] sm:$0xff] %vm266_vm0, %v585_v59 }
 0x13e PF: > { %s13_s12 = sadd.s32 1, %s782_s12  }
 0x13f   : > { %p10_p4 = scmp.ge.s32.totalorder %s13_s12, 4  }
 0x141   :  { %12 = sbr.rel (!%p10_p4) target bundleno = 1 (0x1), region = 62 }

</bundles_post_ra>
